<compile_context>
chip_gen: v5e
topology: v5e:2x2
jax: 0.10.0
libtpu: 0.0.40
codegen_flags: <defaults>
</compile_context>

<pallas_src>
import functools

import jax
import jax.numpy as jnp
from jax.experimental import pallas as pl
from jax.experimental.pallas import tpu as pltpu


# ----------------------------------------------------------------------------
# Tiling helper
# ----------------------------------------------------------------------------

def _pick_tile(n, candidates=(512, 256, 128)):
    """Largest preferred tile dividing n; fall back to the full (small) dim."""
    for t in candidates:
        if n % t == 0:
            return t
    return n


# ----------------------------------------------------------------------------
# Pallas kernels
# ----------------------------------------------------------------------------

def _linear_kernel(x_ref, w_ref, b_ref, o_ref):
    # Node encoder: o = x @ W + b  (bf16 MXU operands, f32 accumulation).
    acc = jnp.dot(x_ref[...].astype(jnp.bfloat16), w_ref[...],
                  preferred_element_type=jnp.float32)
    o_ref[...] = acc + b_ref[...]


def encoder_linear(x, w, b):
    M, K = x.shape
    _, N = w.shape
    tm = _pick_tile(M)
    return pl.pallas_call(
        _linear_kernel,
        out_shape=jax.ShapeDtypeStruct((M, N), jnp.float32),
        grid_spec=pltpu.PrefetchScalarGridSpec(
            num_scalar_prefetch=0,
            grid=(M // tm,),
            in_specs=[
                pl.BlockSpec((tm, K), lambda i: (i, 0)),
                pl.BlockSpec((K, N), lambda i: (0, 0)),
                pl.BlockSpec((1, N), lambda i: (0, 0)),
            ],
            out_specs=pl.BlockSpec((tm, N), lambda i: (i, 0)),
        ),
        compiler_params=pltpu.CompilerParams(
            dimension_semantics=("parallel",)),
    )(x.astype(jnp.float32), w.astype(jnp.bfloat16),
      b.reshape(1, N).astype(jnp.float32))


def _gin_agg_kernel(adj_ref, hk_ref, vnk_ref, hi_ref, vni_ref, e_ref,
                    o_ref, acc_ref, *, one_plus_eps):
    """Fused GIN message + neighbor aggregation + combine.

    msg = relu(h + vn + edge_emb) is built per k-tile and fed straight to the
    MXU; the (1+eps)*(h+vn) + agg combine runs in the final-k epilogue.
    """
    k = pl.program_id(1)

    @pl.when(k == 0)
    def _():
        acc_ref[...] = jnp.zeros_like(acc_ref)

    msg = jnp.maximum(hk_ref[...] + vnk_ref[...] + e_ref[...], 0.0)
    acc_ref[...] += jnp.dot(adj_ref[...], msg.astype(jnp.bfloat16),
                            preferred_element_type=jnp.float32)

    @pl.when(k == pl.num_programs(1) - 1)
    def _():
        h_in = hi_ref[...] + vni_ref[...]
        o_ref[...] = one_plus_eps * h_in + acc_ref[...]


def gin_aggregate(adj_bf16, h, vn_per_node, edge_emb, eps):
    N, D = h.shape
    t = _pick_tile(N)
    kernel = functools.partial(_gin_agg_kernel, one_plus_eps=1.0 + float(eps))
    h = h.astype(jnp.float32)
    vn_per_node = vn_per_node.astype(jnp.float32)
    return pl.pallas_call(
        kernel,
        out_shape=jax.ShapeDtypeStruct((N, D), jnp.float32),
        grid_spec=pltpu.PrefetchScalarGridSpec(
            num_scalar_prefetch=0,
            grid=(N // t, N // t),
            in_specs=[
                pl.BlockSpec((t, t), lambda i, k: (i, k)),   # adj tile
                pl.BlockSpec((t, D), lambda i, k: (k, 0)),   # h  (k rows, msg)
                pl.BlockSpec((t, D), lambda i, k: (k, 0)),   # vn (k rows, msg)
                pl.BlockSpec((t, D), lambda i, k: (i, 0)),   # h  (i rows, h_in)
                pl.BlockSpec((t, D), lambda i, k: (i, 0)),   # vn (i rows, h_in)
                pl.BlockSpec((1, D), lambda i, k: (0, 0)),   # edge embedding
            ],
            out_specs=pl.BlockSpec((t, D), lambda i, k: (i, 0)),
            scratch_shapes=[pltpu.VMEM((t, D), jnp.float32)],
        ),
        compiler_params=pltpu.CompilerParams(
            dimension_semantics=("parallel", "arbitrary")),
    )(adj_bf16, h, vn_per_node, h, vn_per_node,
      edge_emb.reshape(1, D).astype(jnp.float32))


def _gin_mlp_kernel(x_ref, w1_ref, b1_ref, w2_ref, b2_ref, jk_ref,
                    h_ref, jk_out_ref, *, relu_out):
    """Fused 2-layer GIN MLP (BN folded) + JK='sum' accumulation.

    The (tm, hid) hidden activation lives only in VMEM/vregs; never hits HBM.
    """
    h1 = jnp.dot(x_ref[...].astype(jnp.bfloat16), w1_ref[...],
                 preferred_element_type=jnp.float32) + b1_ref[...]
    h1 = jnp.maximum(h1, 0.0)
    h2 = jnp.dot(h1.astype(jnp.bfloat16), w2_ref[...],
                 preferred_element_type=jnp.float32) + b2_ref[...]
    if relu_out:
        h2 = jnp.maximum(h2, 0.0)
    h_ref[...] = h2
    jk_out_ref[...] = jk_ref[...] + h2


def gin_mlp_jk(x, w1, b1, w2, b2, jk, relu_out):
    M, D = x.shape
    H = w1.shape[1]
    tm = _pick_tile(M)
    kernel = functools.partial(_gin_mlp_kernel, relu_out=relu_out)
    return pl.pallas_call(
        kernel,
        out_shape=(jax.ShapeDtypeStruct((M, D), jnp.float32),
                   jax.ShapeDtypeStruct((M, D), jnp.float32)),
        grid_spec=pltpu.PrefetchScalarGridSpec(
            num_scalar_prefetch=0,
            grid=(M // tm,),
            in_specs=[
                pl.BlockSpec((tm, D), lambda i: (i, 0)),
                pl.BlockSpec((D, H), lambda i: (0, 0)),
                pl.BlockSpec((1, H), lambda i: (0, 0)),
                pl.BlockSpec((H, D), lambda i: (0, 0)),
                pl.BlockSpec((1, D), lambda i: (0, 0)),
                pl.BlockSpec((tm, D), lambda i: (i, 0)),
            ],
            out_specs=[
                pl.BlockSpec((tm, D), lambda i: (i, 0)),
                pl.BlockSpec((tm, D), lambda i: (i, 0)),
            ],
        ),
        compiler_params=pltpu.CompilerParams(
            dimension_semantics=("parallel",)),
    )(x.astype(jnp.float32),
      w1.astype(jnp.bfloat16), b1.reshape(1, H).astype(jnp.float32),
      w2.astype(jnp.bfloat16), b2.reshape(1, D).astype(jnp.float32),
      jk.astype(jnp.float32))


# ----------------------------------------------------------------------------
# Parameters (deterministic synthetic init)
# ----------------------------------------------------------------------------

def _fold_bn(W, b, gamma, beta, eps=1e-5):
    # Eval-mode BatchNorm with running_mean=0, running_var=1 folded into the
    # preceding Linear: y = gamma * (Wx + b) / sqrt(1 + eps) + beta
    scale = gamma / jnp.sqrt(1.0 + eps)
    return W * scale[None, :], b * scale + beta


def init_params(key, in_dim, emb_dim, hid_dim, num_layers, num_tasks):
    def rnd(k, shape, s=0.1):
        return s * jax.random.normal(k, shape, jnp.float32)

    keys = iter(jax.random.split(key, 8 + 32 * num_layers))
    params = {
        "cfg": dict(in_dim=in_dim, emb_dim=emb_dim, hid_dim=hid_dim,
                    num_layers=num_layers, num_tasks=num_tasks),
        "W_enc": rnd(next(keys), (in_dim, emb_dim)),
        "b_enc": rnd(next(keys), (emb_dim,)),
        "W_pred": rnd(next(keys), (emb_dim, num_tasks)),
        "b_pred": rnd(next(keys), (num_tasks,)),
        "layers": [],
    }
    for _ in range(num_layers):
        lp = {}
        lp["eps"] = 0.0                                  # GINConv eps init = 0
        lp["edge_emb"] = rnd(next(keys), (emb_dim,))
        # GIN MLP: Linear(D,2D) -> BN -> ReLU -> Linear(2D,D), then outer BN(D)
        W1 = rnd(next(keys), (emb_dim, hid_dim)); b1 = rnd(next(keys), (hid_dim,))
        g1 = 1.0 + rnd(next(keys), (hid_dim,)); be1 = rnd(next(keys), (hid_dim,))
        lp["W1"], lp["b1"] = _fold_bn(W1, b1, g1, be1)
        W2 = rnd(next(keys), (hid_dim, emb_dim)); b2 = rnd(next(keys), (emb_dim,))
        g2 = 1.0 + rnd(next(keys), (emb_dim,)); be2 = rnd(next(keys), (emb_dim,))
        lp["W2"], lp["b2"] = _fold_bn(W2, b2, g2, be2)
        # Virtual-node MLP: Linear(D,2D)->BN->ReLU->Linear(2D,D)->BN->ReLU
        Wv1 = rnd(next(keys), (emb_dim, hid_dim)); bv1 = rnd(next(keys), (hid_dim,))
        gv1 = 1.0 + rnd(next(keys), (hid_dim,)); bev1 = rnd(next(keys), (hid_dim,))
        lp["Wv1"], lp["bv1"] = _fold_bn(Wv1, bv1, gv1, bev1)
        Wv2 = rnd(next(keys), (hid_dim, emb_dim)); bv2 = rnd(next(keys), (emb_dim,))
        gv2 = 1.0 + rnd(next(keys), (emb_dim,)); bev2 = rnd(next(keys), (emb_dim,))
        lp["Wv2"], lp["bv2"] = _fold_bn(Wv2, bv2, gv2, bev2)
        params["layers"].append(lp)
    return params


# ----------------------------------------------------------------------------
# GraphLSH forward = GIN(virtual node, JK='sum', mean pool) -> (embedding, logits)
# ----------------------------------------------------------------------------

def graph_lsh_forward(params, node_feat, adj, node_graph, assign, pool):
    cfg = params["cfg"]
    L = cfg["num_layers"]
    D = cfg["emb_dim"]
    G = assign.shape[0]

    adj_bf16 = adj.astype(jnp.bfloat16)     # adjacency is exactly 0/1 -> lossless

    # Node encoder (stand-in for the categorical AtomEncoder).
    h = encoder_linear(node_feat, params["W_enc"], params["b_enc"])
    # Virtual node embedding initialized to zeros (as in OGB).
    vn = jnp.zeros((G, D), jnp.float32)
    # JK='sum' running accumulator (starts at layer-0 representation).
    jk = h

    for l in range(L):
        lp = params["layers"][l]
        # Broadcast the virtual-node embedding to its member nodes: a cheap
        # gather instead of a degenerate K=G matmul on the MXU.
        vn_per_node = jnp.take(vn, node_graph, axis=0)
        # Fused: msg = relu(h+vn+edge_emb); agg = adj@msg; pre = (1+eps)*(h+vn)+agg
        pre = gin_aggregate(adj_bf16, h, vn_per_node, lp["edge_emb"], lp["eps"])
        # Fused GIN MLP (BN folded) + JK-sum accumulate; ReLU except last layer.
        # dropout(0.5) in eval mode -> identity.
        h_new, jk = gin_mlp_jk(pre, lp["W1"], lp["b1"], lp["W2"], lp["b2"],
                               jk, relu_out=(l != L - 1))
        # Virtual-node update (all but the last layer) — tiny graph-level (G=4)
        # ops kept in plain XLA (sub-(8,128) shapes would only waste the MXU).
        if l < L - 1:
            pooled = assign @ h                          # global add pool (layer input)
            vn_tmp = pooled + vn
            v1 = jnp.maximum(vn_tmp @ lp["Wv1"] + lp["bv1"], 0.0)
            vn = jnp.maximum(v1 @ lp["Wv2"] + lp["bv2"], 0.0)
        h = h_new

    # JK = 'sum' over all layer representations (including layer 0).
    node_rep = jk

    # Graph-level head in plain XLA: mean pooling (G rows) + tiny classifier.
    embedding = pool @ node_rep
    logits = embedding @ params["W_pred"] + params["b_pred"]
    return embedding, logits


# ----------------------------------------------------------------------------

if __name__ == "__main__":
    N_NODES, N_GRAPHS = 64, 4
    IN_DIM, EMB_DIM, HID_DIM = 16, 128, 256
    NUM_LAYERS, NUM_TASKS = 3, 8

    key = jax.random.PRNGKey(0)
    k_param, k_x, k_adj = jax.random.split(key, 3)

    params = init_params(k_param, IN_DIM, EMB_DIM, HID_DIM,
                         NUM_LAYERS, NUM_TASKS)

    # Synthetic graph batch: block-structured membership, dense adjacency.
    node_feat = jax.random.normal(k_x, (N_NODES, IN_DIM), jnp.float32)
    node_graph = jnp.repeat(jnp.arange(N_GRAPHS), N_NODES // N_GRAPHS)
    a = (jax.random.uniform(k_adj, (N_NODES, N_NODES)) < 0.15).astype(jnp.float32)
    adj = jnp.maximum(a, a.T) * (1.0 - jnp.eye(N_NODES, dtype=jnp.float32))
    same_graph = (node_graph[:, None] == node_graph[None, :]).astype(jnp.float32)
    adj = adj * same_graph                              # no cross-graph edges

    assign = (node_graph[None, :] == jnp.arange(N_GRAPHS)[:, None]).astype(jnp.float32)
    pool = assign / jnp.maximum(assign.sum(axis=1, keepdims=True), 1.0)

    embedding, logits = graph_lsh_forward(params, node_feat, adj, node_graph,
                                          assign, pool)
    jax.block_until_ready((embedding, logits))

    assert embedding.shape == (N_GRAPHS, EMB_DIM)
    assert logits.shape == (N_GRAPHS, NUM_TASKS)
    print("KERNEL_OK")
</pallas_src>

<mosaic_0001>
module attributes {stable_mosaic.version = 11 : i64} {
  func.func @_linear_kernel(%arg0: i32, %arg1: memref<64x16xf32, #tpu.memory_space<vmem>>, %arg2: memref<16x128xbf16, #tpu.memory_space<vmem>>, %arg3: memref<1x128xf32, #tpu.memory_space<vmem>>, %arg4: memref<64x128xf32, #tpu.memory_space<vmem>>) attributes {dimension_semantics = [#tpu.dimension_semantics<parallel>], iteration_bounds = array<i64: 1>, scalar_prefetch = 0 : i64, scratch_operands = 0 : i64, tpu.core_type = #tpu.core_type<tc>, window_params = [{transform_indices = @transform_0, window_bounds = array<i64: 64, 16>}, {pipeline_mode = #tpu.pipeline_mode<synchronous>, transform_indices = @transform_1, window_bounds = array<i64: 16, 128>}, {pipeline_mode = #tpu.pipeline_mode<synchronous>, transform_indices = @transform_2, window_bounds = array<i64: 1, 128>}, {transform_indices = @transform_3, window_bounds = array<i64: 64, 128>}]} {
    %c0 = arith.constant 0 : index
    %c0_0 = arith.constant 0 : index
    %0 = vector.load %arg1[%c0, %c0_0] : memref<64x16xf32, #tpu.memory_space<vmem>>, vector<64x16xf32>
    %1 = arith.truncf %0 : vector<64x16xf32> to vector<64x16xbf16>
    %c0_1 = arith.constant 0 : index
    %c0_2 = arith.constant 0 : index
    %2 = vector.load %arg2[%c0_1, %c0_2] : memref<16x128xbf16, #tpu.memory_space<vmem>>, vector<16x128xbf16>
    %cst = arith.constant dense<0.000000e+00> : vector<64x128xf32>
    %3 = tpu.matmul %1, %2, %cst {dimension_numbers = #tpu.dot_dimension_numbers<[1], [0], [0], [1], [0, 0, 1, 1], [], []>} : vector<64x16xbf16>, vector<16x128xbf16>, vector<64x128xf32> -> vector<64x128xf32>
    %c0_3 = arith.constant 0 : index
    %c0_4 = arith.constant 0 : index
    %4 = vector.load %arg3[%c0_3, %c0_4] : memref<1x128xf32, #tpu.memory_space<vmem>>, vector<1x128xf32>
    %5 = vector.broadcast %4 : vector<1x128xf32> to vector<64x128xf32>
    %6 = arith.addf %3, %5 : vector<64x128xf32>
    %c0_5 = arith.constant 0 : index
    %c0_6 = arith.constant 0 : index
    %7 = vector.load %arg4[%c0_5, %c0_6] : memref<64x128xf32, #tpu.memory_space<vmem>>, vector<64x128xf32>
    tpu.vector_store %arg4[%c0_5, %c0_6], %6 {strides = array<i32>} : memref<64x128xf32, #tpu.memory_space<vmem>>, vector<64x128xf32>,
    return
  }
  func.func @transform_0(%arg0: i32) -> (i32, i32) {
    %c0_i32 = arith.constant 0 : i32
    %c0_i32_0 = arith.constant 0 : i32
    return %arg0, %c0_i32 : i32, i32
  }
  func.func @transform_1(%arg0: i32) -> (i32, i32) {
    %c0_i32 = arith.constant 0 : i32
    %c0_i32_0 = arith.constant 0 : i32
    %c0_i32_1 = arith.constant 0 : i32
    return %c0_i32, %c0_i32_0 : i32, i32
  }
  func.func @transform_2(%arg0: i32) -> (i32, i32) {
    %c0_i32 = arith.constant 0 : i32
    %c0_i32_0 = arith.constant 0 : i32
    %c0_i32_1 = arith.constant 0 : i32
    return %c0_i32, %c0_i32_0 : i32, i32
  }
  func.func @transform_3(%arg0: i32) -> (i32, i32) {
    %c0_i32 = arith.constant 0 : i32
    %c0_i32_0 = arith.constant 0 : i32
    return %arg0, %c0_i32 : i32, i32
  }
}

</mosaic_0001>

<bundles_post_ra>
// kernel: tpu_custom_call.1
= control target key start
LH: loop header
LB: loop body
LE: loop exit
PB: predicated region body
PF: predicated region fallthrough
CT: control target
= control target key end

     0   :  { %vm40_vm0 = vcmask 130048   ;;  %s206_s0 = inlined_call_operand.vmem [shape: f32[64,16], index: 0, kind: input, shape index: {}]   ;;  %s207_s1 = inlined_call_operand.vmem [shape: bf16[16,128], index: 1, kind: input, shape index: {}]   ;;  %s208_s2 = inlined_call_operand.vmem [shape: f32[1,128], index: 2, kind: input, shape index: {}]   ;;  %s209_s3 = inlined_call_operand.hbm [shape: f32[64,128], index: 3, kind: output, shape index: {}]  }
   0x1   :  { %v116_v0 = vld [vmem:[%s207_s1] sm:$0xff]  ;;  %v17_v2 = vld [vmem:[%s206_s0 + $0x8] sm:$0xff]  ;;  %v18_v4 = vld [vmem:[%s206_s0 + $0x10] sm:$0xff] }
   0x2   :  { %v16_v1 = vld [vmem:[%s206_s0] sm:$0xff]  ;;  %v19_v5 = vld [vmem:[%s206_s0 + $0x18] sm:$0xff]  ;;  %60 = vmatpush.bf16.msra.mxu0 %v116_v0  ;;  %117 = vmatpush.bf16.msra.mxu1 %v116_v0  ;;  %v21_v8 = vld [vmem:[%s206_s0 + $0x28] sm:$0xff] }
   0x3   :  { %v24_v3 = vpack.c.bf16 %v17_v2, %v16_v1  ;;  %v20_v6 = vld [vmem:[%s206_s0 + $0x20] sm:$0xff]  ;;  %v25_v7 = vpack.c.bf16 %v19_v5, %v18_v4  ;;  %v22_v9 = vld [vmem:[%s206_s0 + $0x30] sm:$0xff]  ;;  %v23_v10 = vld [vmem:[%s206_s0 + $0x38] sm:$0xff]  ;;  %118 = vmatpush.bf16.msra.mxu2 %v116_v0  ;;  %119 = vmatpush.bf16.msra.mxu3 %v116_v0 }
   0x4   :  { %v26_v11 = vpack.c.bf16 %v21_v8, %v20_v6  ;;  %v27_v12 = vpack.c.bf16 %v23_v10, %v22_v9 }
   0x5   :  { %8 = vsyncpa [#allocation3], 0  ;;  %112 = vmatmul.msk.bf16.vlgmr.msra.gmra.mxu0 %vm40_vm0, %v24_v3  ;;  %113 = vmatmul.msk.bf16.vlgmr.msra.gmra.mxu1 %vm40_vm0, %v25_v7  ;;  %v123_v13 = vld [vmem:[%s208_s2] ss:$0 sm:$0xff]  ;;  %s150_s0 = smov [#allocation2]   ;;  %s96_s6 = sshll.u32 %s209_s3, 4  ;;  %s97_s6 = int_to_ptr.hbm [resolvable:$true] %s96_s6 }
   0x6   :  { %114 = vmatmul.msk.bf16.vlgmr.msra.gmra.mxu2 %vm40_vm0, %v26_v11  ;;  %115 = vmatmul.msk.bf16.vlgmr.msra.gmra.mxu3 %vm40_vm0, %v27_v12  ;;  %s94_s2 = sshll.u32 %s150_s0, 4  ;;  %s151_s7 = smov 128   ;;  %s95_s2 = int_to_ptr.vmem [resolvable:$true] %s94_s2 }
   0x7   :  { %s152_s8 = smov 8  }
  0x82   :  { %v62_v14 = vpop.f32.mrf.mxu0  ;;  %v67_v15 = vpop.f32.mrf.mxu1 }
  0x83   :  { %v63_v16 = vadd.f32 %v123_v13, %v62_v14  ;;  %v68_v17 = vadd.f32 %v123_v13, %v67_v15 }
  0x85   :  { %82 = vst [vmem:[#allocation2] sm:$0xff] %v63_v16 }
  0x86   :  { %84 = vst [vmem:[#allocation2 + $0x10] sm:$0xff] %v68_v17 }
  0x89   :  { %v72_v18 = vpop.f32.mrf.mxu2  ;;  %v77_v19 = vpop.f32.mrf.mxu3 }
  0x8a   :  { %v73_v20 = vadd.f32 %v123_v13, %v72_v18  ;;  %v78_v21 = vadd.f32 %v123_v13, %v77_v19  ;;  %v64_v22 = vpop.f32.mrf.mxu0  ;;  %v69_v23 = vpop.f32.mrf.mxu1 }
  0x8b   :  { %v65_v24 = vadd.f32 %v123_v13, %v64_v22  ;;  %v70_v25 = vadd.f32 %v123_v13, %v69_v23 }
  0x8c   :  { %86 = vst [vmem:[#allocation2 + $0x20] sm:$0xff] %v73_v20 }
  0x8d   :  { %88 = vst [vmem:[#allocation2 + $0x30] sm:$0xff] %v78_v21 }
  0x8e   :  { %83 = vst [vmem:[#allocation2 + $0x8] sm:$0xff] %v65_v24 }
  0x8f   :  { %85 = vst [vmem:[#allocation2 + $0x18] sm:$0xff] %v70_v25 }
  0x91   :  { %v74_v26 = vpop.f32.mrf.mxu2  ;;  %v79_v27 = vpop.f32.mrf.mxu3 }
  0x92   :  { %v75_v28 = vadd.f32 %v123_v13, %v74_v26  ;;  %v80_v29 = vadd.f32 %v123_v13, %v79_v27 }
  0x94   :  { %87 = vst [vmem:[#allocation2 + $0x28] sm:$0xff] %v75_v28 }
  0x95   :  { %89 = vst [vmem:[#allocation2 + $0x38] sm:$0xff] %v80_v29 }
  0x96   :  { %102 = dma.vmem_to_hbm [thread:$0]  %s95_s2, 1024, %s97_s6, [#allocation3], %s151_s7, %s151_s7, %s152_s8  }
  0x97   :  { %148 = dma.done.wait [#allocation3], 1024  }
  0x98   :  { %149 = vsyncadd [#allocation3], 4294966272 }
  0x99   :  { %107 = vsyncpa [#allocation3], 1 }

</bundles_post_ra>
